<compile_context>
chip_gen: v7x
topology: tpu7x:2x2x1
jax: 0.10.0
libtpu: 0.0.40
codegen_flags: <defaults>
</compile_context>

<pallas_src>
import functools

import jax
import jax.numpy as jnp
from jax.experimental import pallas as pl
from jax.experimental.pallas import tpu as pltpu

HIDDEN = 256
LOG_STD_MIN = -20.0
LOG_STD_MAX = 2.0
LANE = 128
TB_MAX = 1024  # max batch rows per grid step (VMEM per block stays < ~1.5 MiB)


def _round_up(x, m):
    return ((x + m - 1) // m) * m


def _cdiv(a, b):
    return -(-a // b)


def _batch_tiling(B):
    """Pick (TB, Bp, n_steps) for the batch grid.

    As few grid steps as possible (per-step overhead ~0.35us), but at least 2
    for batches worth splitting so dimension_semantics=("parallel",) actually
    uses both TensorCores on v7x.  TB is a multiple of 16 (bf16 sublane
    packing) and sized to minimize batch padding.
    """
    n_steps = _cdiv(B, TB_MAX)
    if B > 32 and n_steps % 2 == 1:
        n_steps += 1
    TB = _round_up(_cdiv(B, n_steps), 16)
    Bp = TB * n_steps
    return TB, Bp, n_steps


def actor_kernel(x_ref, w1_ref, b1_ref, w2_ref, b2_ref, wh_ref, bh_ref,
                 out_ref, *, action_dim):
    # State arrives f32; cast to bf16 in-kernel (VPU pack, hidden under MXU).
    x = x_ref[...].astype(jnp.bfloat16)

    # Layer 1: bf16 MXU matmul, f32 accumulate, f32 epilogue.
    h = jnp.dot(x, w1_ref[...], preferred_element_type=jnp.float32)
    h = jnp.maximum(h + b1_ref[...], 0.0).astype(jnp.bfloat16)

    # Layer 2.
    h = jnp.dot(h, w2_ref[...], preferred_element_type=jnp.float32)
    h = jnp.maximum(h + b2_ref[...], 0.0).astype(jnp.bfloat16)

    # Fused heads: lanes [0, action_dim) = mean, [action_dim, 2*action_dim) =
    # log_std, remaining lanes are zero padding (lane-dense unmasked store).
    head = jnp.dot(h, wh_ref[...], preferred_element_type=jnp.float32)
    head = head + bh_ref[...]

    # Clamp only the log_std lanes; mean lanes (and padding) pass through.
    lane = jax.lax.broadcasted_iota(jnp.int32, head.shape, 1)
    is_log_std = (lane >= action_dim) & (lane < 2 * action_dim)
    head = jnp.where(is_log_std,
                     jnp.clip(head, LOG_STD_MIN, LOG_STD_MAX),
                     head)

    out_ref[...] = head.astype(out_ref.dtype)


def prepare_actor_params(params):
    """One-time packing/casting of Actor weights for the Pallas kernel.

    Do this once per optimizer step (or once, if weights are frozen) -- NOT
    every forward call: it is ~6 XLA ops over ~200 KiB of weights, which would
    otherwise dominate this microsecond-scale kernel.
    """
    action_dim = params["wm"].shape[1]
    pad_out = _round_up(max(2 * action_dim, LANE), LANE)

    wh = jnp.zeros((HIDDEN, pad_out), jnp.float32)
    wh = wh.at[:, :action_dim].set(params["wm"])
    wh = wh.at[:, action_dim:2 * action_dim].set(params["ws"])
    bh = jnp.zeros((1, pad_out), jnp.float32)
    bh = bh.at[:, :action_dim].set(params["bm"])
    bh = bh.at[:, action_dim:2 * action_dim].set(params["bs"])

    return {
        # bf16 matmul operands (accumulation stays f32 inside the kernel).
        "w1": params["w1"].astype(jnp.bfloat16),
        "w2": params["w2"].astype(jnp.bfloat16),
        "wh": wh.astype(jnp.bfloat16),
        # f32 biases (added to the f32 accumulator).
        "b1": params["b1"].astype(jnp.float32),
        "b2": params["b2"].astype(jnp.float32),
        "bh": bh.astype(jnp.float32),
    }


def actor_forward(state, prepared, *, action_dim):
    """state: [B, state_dim] f32. prepared: prepare_actor_params(...) output.

    Returns (mean, log_std), both [B, action_dim] f32.
    """
    B, state_dim = state.shape
    pad_out = prepared["wh"].shape[1]

    TB, Bp, n_steps = _batch_tiling(B)
    x = state.astype(jnp.float32)
    if Bp != B:
        x = jnp.pad(x, ((0, Bp - B), (0, 0)))

    kernel = functools.partial(actor_kernel, action_dim=action_dim)

    out = pl.pallas_call(
        kernel,
        out_shape=jax.ShapeDtypeStruct((Bp, pad_out), jnp.float32),
        grid_spec=pltpu.PrefetchScalarGridSpec(
            num_scalar_prefetch=0,
            grid=(n_steps,),
            in_specs=[
                # Activations: tiled along batch, pipelined across grid steps.
                pl.BlockSpec((TB, state_dim), lambda i: (i, 0)),
                # Weights / biases: constant index_map -> DMA'd once, resident
                # in VMEM for the whole grid (~200 KiB; no extra buffering
                # needed even on v7x's 64 MiB VMEM).
                pl.BlockSpec((state_dim, HIDDEN), lambda i: (0, 0)),
                pl.BlockSpec((1, HIDDEN), lambda i: (0, 0)),
                pl.BlockSpec((HIDDEN, HIDDEN), lambda i: (0, 0)),
                pl.BlockSpec((1, HIDDEN), lambda i: (0, 0)),
                pl.BlockSpec((HIDDEN, pad_out), lambda i: (0, 0)),
                pl.BlockSpec((1, pad_out), lambda i: (0, 0)),
            ],
            out_specs=pl.BlockSpec((TB, pad_out), lambda i: (i, 0)),
        ),
        compiler_params=pltpu.CompilerParams(
            dimension_semantics=("parallel",),  # shards batch steps over TCs (v7x)
            vmem_limit_bytes=32 * 1024 * 1024,
        ),
    )(x, prepared["w1"], prepared["b1"], prepared["w2"], prepared["b2"],
      prepared["wh"], prepared["bh"])

    mean = out[:B, :action_dim]
    log_std = out[:B, action_dim:2 * action_dim]
    return mean, log_std


def init_actor_params(key, state_dim, action_dim, init_w=0.003):
    """Mirrors the PyTorch Actor.__init__ shapes/init. Weights stored as [in, out]."""
    k = jax.random.split(key, 8)

    def uni(k_, shape, bound):
        return jax.random.uniform(k_, shape, jnp.float32, -bound, bound)

    b1 = 1.0 / jnp.sqrt(jnp.float32(state_dim))
    b2 = 1.0 / jnp.sqrt(jnp.float32(HIDDEN))

    return {
        "w1": uni(k[0], (state_dim, HIDDEN), b1),
        "b1": uni(k[1], (1, HIDDEN), b1),
        "w2": uni(k[2], (HIDDEN, HIDDEN), b2),
        "b2": uni(k[3], (1, HIDDEN), b2),
        "wm": uni(k[4], (HIDDEN, action_dim), init_w),
        "bm": uni(k[5], (1, action_dim), init_w),
        "ws": uni(k[6], (HIDDEN, action_dim), init_w),
        "bs": uni(k[7], (1, action_dim), init_w),
    }


def actor_forward_ref(state, params):
    """Pure-JAX f32 reference (same math as the PyTorch forward)."""
    h = jnp.maximum(state @ params["w1"] + params["b1"], 0.0)
    h = jnp.maximum(h @ params["w2"] + params["b2"], 0.0)
    mean = h @ params["wm"] + params["bm"]
    log_std = jnp.clip(h @ params["ws"] + params["bs"], LOG_STD_MIN, LOG_STD_MAX)
    return mean, log_std


if __name__ == "__main__":
    key = jax.random.PRNGKey(0)
    k_param, k_state, k_state2 = jax.random.split(key, 3)

    state_dim = 16     # small continuous-control observation space
    action_dim = 4     # small continuous action space
    params = init_actor_params(k_param, state_dim, action_dim)

    # One-time weight packing / casting (outside the per-step forward path).
    prepared = jax.block_until_ready(prepare_actor_params(params))
    fwd = jax.jit(functools.partial(actor_forward, action_dim=action_dim))

    # Small-batch check (single grid step).
    batch = 8
    state = jax.random.normal(k_state, (batch, state_dim), jnp.float32)
    mean, log_std = jax.block_until_ready(fwd(state, prepared))
    mean_ref, log_std_ref = actor_forward_ref(state, params)
    assert mean.shape == (batch, action_dim) and log_std.shape == (batch, action_dim)
    # bf16 matmul operands -> compare against f32 reference with loose tolerance.
    assert jnp.allclose(mean, mean_ref, atol=1e-2, rtol=1e-2)
    assert jnp.allclose(log_std, log_std_ref, atol=1e-2, rtol=1e-2)
    assert jnp.all(log_std >= LOG_STD_MIN) and jnp.all(log_std <= LOG_STD_MAX)

    # Larger, non-multiple batch exercises the 2-step grid (v7x megacore path)
    # with minimal padding (300 -> 2 x 160 rows instead of padding to 512).
    batch2 = 300
    state2 = jax.random.normal(k_state2, (batch2, state_dim), jnp.float32)
    mean2, log_std2 = jax.block_until_ready(fwd(state2, prepared))
    mean2_ref, log_std2_ref = actor_forward_ref(state2, params)
    assert mean2.shape == (batch2, action_dim) and log_std2.shape == (batch2, action_dim)
    assert jnp.allclose(mean2, mean2_ref, atol=1e-2, rtol=1e-2)
    assert jnp.allclose(log_std2, log_std2_ref, atol=1e-2, rtol=1e-2)

    print("KERNEL_OK")
</pallas_src>

<mosaic_0001>
module attributes {stable_mosaic.version = 11 : i64} {
  func.func @actor_kernel(%arg0: i32, %arg1: memref<16x16xf32, #tpu.memory_space<vmem>>, %arg2: memref<16x256xbf16, #tpu.memory_space<vmem>>, %arg3: memref<1x256xf32, #tpu.memory_space<vmem>>, %arg4: memref<256x256xbf16, #tpu.memory_space<vmem>>, %arg5: memref<1x256xf32, #tpu.memory_space<vmem>>, %arg6: memref<256x128xbf16, #tpu.memory_space<vmem>>, %arg7: memref<1x128xf32, #tpu.memory_space<vmem>>, %arg8: memref<16x128xf32, #tpu.memory_space<vmem>>) attributes {dimension_semantics = [#tpu.dimension_semantics<parallel>], iteration_bounds = array<i64: 1>, scalar_prefetch = 0 : i64, scratch_operands = 0 : i64, tpu.core_type = #tpu.core_type<tc>, window_params = [{transform_indices = @transform_0, window_bounds = array<i64: 16, 16>}, {pipeline_mode = #tpu.pipeline_mode<synchronous>, transform_indices = @transform_1, window_bounds = array<i64: 16, 256>}, {pipeline_mode = #tpu.pipeline_mode<synchronous>, transform_indices = @transform_2, window_bounds = array<i64: 1, 256>}, {pipeline_mode = #tpu.pipeline_mode<synchronous>, transform_indices = @transform_3, window_bounds = array<i64: 256, 256>}, {pipeline_mode = #tpu.pipeline_mode<synchronous>, transform_indices = @transform_4, window_bounds = array<i64: 1, 256>}, {pipeline_mode = #tpu.pipeline_mode<synchronous>, transform_indices = @transform_5, window_bounds = array<i64: 256, 128>}, {pipeline_mode = #tpu.pipeline_mode<synchronous>, transform_indices = @transform_6, window_bounds = array<i64: 1, 128>}, {transform_indices = @transform_7, window_bounds = array<i64: 16, 128>}]} {
    %c0 = arith.constant 0 : index
    %c0_0 = arith.constant 0 : index
    %0 = vector.load %arg1[%c0, %c0_0] : memref<16x16xf32, #tpu.memory_space<vmem>>, vector<16x16xf32>
    %1 = arith.truncf %0 : vector<16x16xf32> to vector<16x16xbf16>
    %c0_1 = arith.constant 0 : index
    %c0_2 = arith.constant 0 : index
    %2 = vector.load %arg2[%c0_1, %c0_2] : memref<16x256xbf16, #tpu.memory_space<vmem>>, vector<16x256xbf16>
    %cst = arith.constant dense<0.000000e+00> : vector<16x256xf32>
    %3 = tpu.matmul %1, %2, %cst {dimension_numbers = #tpu.dot_dimension_numbers<[1], [0], [0], [1], [0, 0, 1, 1], [], []>} : vector<16x16xbf16>, vector<16x256xbf16>, vector<16x256xf32> -> vector<16x256xf32>
    %c0_3 = arith.constant 0 : index
    %c0_4 = arith.constant 0 : index
    %4 = vector.load %arg3[%c0_3, %c0_4] : memref<1x256xf32, #tpu.memory_space<vmem>>, vector<1x256xf32>
    %5 = vector.broadcast %4 : vector<1x256xf32> to vector<16x256xf32>
    %6 = arith.addf %3, %5 : vector<16x256xf32>
    %cst_5 = arith.constant 0.000000e+00 : f32
    %7 = vector.broadcast %cst_5 : f32 to vector<16x256xf32>
    %8 = arith.maximumf %6, %7 : vector<16x256xf32>
    %9 = arith.truncf %8 : vector<16x256xf32> to vector<16x256xbf16>
    %c0_6 = arith.constant 0 : index
    %c0_7 = arith.constant 0 : index
    %10 = vector.load %arg4[%c0_6, %c0_7] : memref<256x256xbf16, #tpu.memory_space<vmem>>, vector<256x256xbf16>
    %cst_8 = arith.constant dense<0.000000e+00> : vector<16x256xf32>
    %11 = tpu.matmul %9, %10, %cst_8 {dimension_numbers = #tpu.dot_dimension_numbers<[1], [0], [0], [1], [0, 0, 1, 1], [], []>} : vector<16x256xbf16>, vector<256x256xbf16>, vector<16x256xf32> -> vector<16x256xf32>
    %c0_9 = arith.constant 0 : index
    %c0_10 = arith.constant 0 : index
    %12 = vector.load %arg5[%c0_9, %c0_10] : memref<1x256xf32, #tpu.memory_space<vmem>>, vector<1x256xf32>
    %13 = vector.broadcast %12 : vector<1x256xf32> to vector<16x256xf32>
    %14 = arith.addf %11, %13 : vector<16x256xf32>
    %cst_11 = arith.constant 0.000000e+00 : f32
    %15 = vector.broadcast %cst_11 : f32 to vector<16x256xf32>
    %16 = arith.maximumf %14, %15 : vector<16x256xf32>
    %17 = arith.truncf %16 : vector<16x256xf32> to vector<16x256xbf16>
    %c0_12 = arith.constant 0 : index
    %c0_13 = arith.constant 0 : index
    %18 = vector.load %arg6[%c0_12, %c0_13] : memref<256x128xbf16, #tpu.memory_space<vmem>>, vector<256x128xbf16>
    %cst_14 = arith.constant dense<0.000000e+00> : vector<16x128xf32>
    %19 = tpu.matmul %17, %18, %cst_14 {dimension_numbers = #tpu.dot_dimension_numbers<[1], [0], [0], [1], [0, 0, 1, 1], [], []>} : vector<16x256xbf16>, vector<256x128xbf16>, vector<16x128xf32> -> vector<16x128xf32>
    %c0_15 = arith.constant 0 : index
    %c0_16 = arith.constant 0 : index
    %20 = vector.load %arg7[%c0_15, %c0_16] : memref<1x128xf32, #tpu.memory_space<vmem>>, vector<1x128xf32>
    %21 = vector.broadcast %20 : vector<1x128xf32> to vector<16x128xf32>
    %22 = arith.addf %19, %21 : vector<16x128xf32>
    %23 = tpu.iota {dimensions = array<i32: 1>} : vector<16x128xi32>
    %c4_i32 = arith.constant 4 : i32
    %24 = vector.broadcast %c4_i32 : i32 to vector<16x128xi32>
    %25 = arith.cmpi sge, %23, %24 : vector<16x128xi32>
    %c8_i32 = arith.constant 8 : i32
    %26 = vector.broadcast %c8_i32 : i32 to vector<16x128xi32>
    %27 = arith.cmpi slt, %23, %26 : vector<16x128xi32>
    %28 = arith.andi %25, %27 : vector<16x128xi1>
    %cst_17 = arith.constant -2.000000e+01 : f32
    %cst_18 = arith.constant 2.000000e+00 : f32
    %29 = vector.broadcast %cst_17 : f32 to vector<16x128xf32>
    %30 = arith.maximumf %29, %22 : vector<16x128xf32>
    %31 = vector.broadcast %cst_18 : f32 to vector<16x128xf32>
    %32 = arith.minimumf %31, %30 : vector<16x128xf32>
    %33 = arith.select %28, %32, %22 : vector<16x128xi1>, vector<16x128xf32>
    %c0_19 = arith.constant 0 : index
    %c0_20 = arith.constant 0 : index
    %34 = vector.load %arg8[%c0_19, %c0_20] : memref<16x128xf32, #tpu.memory_space<vmem>>, vector<16x128xf32>
    tpu.vector_store %arg8[%c0_19, %c0_20], %33 {strides = array<i32>} : memref<16x128xf32, #tpu.memory_space<vmem>>, vector<16x128xf32>,
    return
  }
  func.func @transform_0(%arg0: i32) -> (i32, i32) {
    %c0_i32 = arith.constant 0 : i32
    %c0_i32_0 = arith.constant 0 : i32
    return %arg0, %c0_i32 : i32, i32
  }
  func.func @transform_1(%arg0: i32) -> (i32, i32) {
    %c0_i32 = arith.constant 0 : i32
    %c0_i32_0 = arith.constant 0 : i32
    %c0_i32_1 = arith.constant 0 : i32
    return %c0_i32, %c0_i32_0 : i32, i32
  }
  func.func @transform_2(%arg0: i32) -> (i32, i32) {
    %c0_i32 = arith.constant 0 : i32
    %c0_i32_0 = arith.constant 0 : i32
    %c0_i32_1 = arith.constant 0 : i32
    return %c0_i32, %c0_i32_0 : i32, i32
  }
  func.func @transform_3(%arg0: i32) -> (i32, i32) {
    %c0_i32 = arith.constant 0 : i32
    %c0_i32_0 = arith.constant 0 : i32
    %c0_i32_1 = arith.constant 0 : i32
    return %c0_i32, %c0_i32_0 : i32, i32
  }
  func.func @transform_4(%arg0: i32) -> (i32, i32) {
    %c0_i32 = arith.constant 0 : i32
    %c0_i32_0 = arith.constant 0 : i32
    %c0_i32_1 = arith.constant 0 : i32
    return %c0_i32, %c0_i32_0 : i32, i32
  }
  func.func @transform_5(%arg0: i32) -> (i32, i32) {
    %c0_i32 = arith.constant 0 : i32
    %c0_i32_0 = arith.constant 0 : i32
    %c0_i32_1 = arith.constant 0 : i32
    return %c0_i32, %c0_i32_0 : i32, i32
  }
  func.func @transform_6(%arg0: i32) -> (i32, i32) {
    %c0_i32 = arith.constant 0 : i32
    %c0_i32_0 = arith.constant 0 : i32
    %c0_i32_1 = arith.constant 0 : i32
    return %c0_i32, %c0_i32_0 : i32, i32
  }
  func.func @transform_7(%arg0: i32) -> (i32, i32) {
    %c0_i32 = arith.constant 0 : i32
    %c0_i32_0 = arith.constant 0 : i32
    return %arg0, %c0_i32 : i32, i32
  }
}

</mosaic_0001>

<bundles_post_ra>
// kernel: actor_forward.1
= control target key start
LH: loop header
LB: loop body
LE: loop exit
PB: predicated region body
PF: predicated region fallthrough
CT: control target
= control target key end

     0   :  { %12 = vsyncpa [#allocation3], 0  ;;  %s877_s0 = inlined_call_operand.vmem [shape: f32[16,16], index: 0, kind: input, shape index: {}]   ;;  %s878_s1 = inlined_call_operand.vmem [shape: bf16[16,256], index: 1, kind: input, shape index: {}]   ;;  %s879_s2 = inlined_call_operand.vmem [shape: f32[1,256], index: 2, kind: input, shape index: {}]   ;;  %s880_s3 = inlined_call_operand.hbm [shape: bf16[256,256], index: 3, kind: input, shape index: {}]   ;;  %s881_s4 = inlined_call_operand.vmem [shape: f32[1,256], index: 4, kind: input, shape index: {}]   ;;  %s882_s5 = inlined_call_operand.hbm [shape: bf16[256,128], index: 5, kind: input, shape index: {}]   ;;  %s883_s6 = inlined_call_operand.vmem [shape: f32[1,128], index: 6, kind: input, shape index: {}]   ;;  %s884_s7 = inlined_call_operand.vmem [shape: f32[16,128], index: 7, kind: output, shape index: {}]  }
   0x1   :  { %13 = vsyncpa [#allocation5], 0  ;;  %s779_s24 = smov [#allocation2]   ;;  %s731_s28 = scalar_lea.hbm %s880_s3, 4096 }
   0x2   :  { %s25_s25 = sshll.u32 %s779_s24, 4  ;;  %p732_p0 = scmp.ne.s32.totalorder %s880_s3, %s731_s28  ;;  %s26_s25 = int_to_ptr.vmem [resolvable:$true] %s25_s25 }
   0x3   :  { %p735_p1 = scmp.lt.u32.totalorder %s731_s28, %s880_s3 }
   0x5   :  { %p737_p2 = pnand %p735_p1, %p732_p0 }
   0x7   :  { %740 = shalt.err (!%p737_p2)
}
   0x8   :  { %s741_s10 = scalar_lea.vmem %s26_s25, 4096  ;;  %p746_p4 = scmp.lt.s32.totalorder %s26_s25, %s26_s25 }
   0x9   :  { %p742_p3 = scmp.ne.s32.totalorder %s26_s25, %s741_s10  ;;  %p747_p5 = scmp.lt.s32.totalorder %s741_s10, %s741_s10 }
   0xb   :  { %p748_p6 = por %p747_p5, %p746_p4 }
   0xd   :  { %p749_p7 = pnand %p748_p6, %p742_p3 }
   0xf   :  { %752 = shalt.err (!%p749_p7)
}
  0x10   :  { %s780_s11 = smov 128   ;;  %s781_s12 = smov 8  }
  0x11   :  { %31 = dma.hbm_to_vmem [thread:$0]  %s880_s3, 4096, %s26_s25, [#allocation3], %s780_s11, %s780_s11, %s781_s12  }
  0x12   :  { %s782_s15 = smov [#allocation4]   ;;  %s753_s19 = scalar_lea.hbm %s882_s5, 2048 }
  0x13   :  { %s39_s16 = sshll.u32 %s782_s15, 4  ;;  %p754_p8 = scmp.ne.s32.totalorder %s882_s5, %s753_s19  ;;  %s40_s16 = int_to_ptr.vmem [resolvable:$true] %s39_s16 }
  0x14   :  { %p757_p9 = scmp.lt.u32.totalorder %s753_s19, %s882_s5 }
  0x16   :  { %p759_p10 = pnand %p757_p9, %p754_p8 }
  0x18   :  { %762 = shalt.err (!%p759_p10)
}
  0x19   :  { %s763_s24 = scalar_lea.vmem %s40_s16, 2048  ;;  %p768_p12 = scmp.lt.s32.totalorder %s40_s16, %s40_s16 }
  0x1a   :  { %p764_p11 = scmp.ne.s32.totalorder %s40_s16, %s763_s24  ;;  %p769_p13 = scmp.lt.s32.totalorder %s763_s24, %s763_s24 }
  0x1c   :  { %p770_p0 = por %p769_p13, %p768_p12 }
  0x1e   :  { %p771_p1 = pnand %p770_p0, %p764_p11 }
  0x20   :  { %774 = shalt.err (!%p771_p1)
}
  0x21   :  { %s783_s3 = smov 64   ;;  %s784_s25 = smov 4  }
  0x22   :  { %45 = dma.hbm_to_vmem [thread:$0]  %s882_s5, 2048, %s40_s16, [#allocation5], %s783_s3, %s783_s3, %s784_s25  }
  0x23   :  { %775 = dma.done.wait [#allocation3], 4096  }
  0x24   :  { %776 = vsyncadd [#allocation3], 4294963200 }
  0x25   :  { %777 = dma.done.wait [#allocation5], 2048  }
  0x26   :  { %778 = vsyncadd [#allocation5], 4294965248  ;;  %v785_v0 = vmov 0   ;;  %v664_v1 = vld [vmem:[%s878_s1 + $0x4] ss:$8 sps:$4 sm:$0xff]   ;;  %vm82_vm0 = vcmask 130048   ;;  %v62_v49 = vlaneseq }
  0x27   :  { %118 = vmatprep.mubr.bf16.mxu0 %v785_v0  ;;  %v666_v2 = vld [vmem:[%s878_s1] ss:$8 sps:$4 sm:$0xff]   ;;  %86 = vmatprep.subr.bf16.mxu0 %v664_v1  ;;  %v667_v6 = vld [vmem:[#allocation2 + $0x4] ss:$8 sps:$4 sm:$0xff]   ;;  %v670_v8 = vld [vmem:[#allocation2 + $0x14] ss:$8 sps:$4 sm:$0xff]  }
  0x28   :  { %v55_v3 = vld [vmem:[%s877_s0] sm:$0xff]  ;;  %v56_v4 = vld [vmem:[%s877_s0 + $0x8] sm:$0xff]  ;;  %87 = vmatpush1.bf16.msra.mxu0 %v666_v2  ;;  %339 = vmatprep.subr.bf16.mxu1 %v667_v6  ;;  %v672_v9 = vld [vmem:[#allocation2 + $0x10] ss:$8 sps:$4 sm:$0xff]   ;;  %v63_v50 = vshrl.u32 %v62_v49, 7 }
  0x29   :  { %v57_v5 = vpack.c.bf16 %v56_v4, %v55_v3  ;;  %v669_v7 = vld [vmem:[#allocation2] ss:$8 sps:$4 sm:$0xff]   ;;  %v673_v10 = vld [vmem:[#allocation2 + $0x24] ss:$8 sps:$4 sm:$0xff]   ;;  %v676_v12 = vld [vmem:[#allocation2 + $0x34] ss:$8 sps:$4 sm:$0xff]  }
  0x2a   :  { %340 = vmatpush1.bf16.msra.mxu1 %v669_v7  ;;  %v675_v11 = vld [vmem:[#allocation2 + $0x20] ss:$8 sps:$4 sm:$0xff]   ;;  %v678_v13 = vld [vmem:[#allocation2 + $0x30] ss:$8 sps:$4 sm:$0xff]   ;;  %v679_v14 = vld [vmem:[#allocation2 + $0x44] ss:$8 sps:$4 sm:$0xff]  }
  0x2b   :  { %585 = vmatmul.mubr.msk.bf16.vlgmr.msra.gmra.mrb[0].mxu0 %vm82_vm0, %v57_v5  ;;  %341 = vmatprep.subr.bf16.mxu1 %v670_v8  ;;  %v681_v15 = vld [vmem:[#allocation2 + $0x40] ss:$8 sps:$4 sm:$0xff]   ;;  %v682_v16 = vld [vmem:[#allocation2 + $0x54] ss:$8 sps:$4 sm:$0xff]   ;;  %v684_v17 = vld [vmem:[#allocation2 + $0x50] ss:$8 sps:$4 sm:$0xff]  }
  0x2c   :  { %v685_v18 = vld [vmem:[#allocation2 + $0x64] ss:$8 sps:$4 sm:$0xff]   ;;  %v687_v19 = vld [vmem:[#allocation2 + $0x60] ss:$8 sps:$4 sm:$0xff]   ;;  %v688_v20 = vld [vmem:[#allocation2 + $0x74] ss:$8 sps:$4 sm:$0xff]  }
  0x2d   :  { %v690_v21 = vld [vmem:[#allocation2 + $0x70] ss:$8 sps:$4 sm:$0xff]   ;;  %v691_v22 = vld [vmem:[#allocation2 + $0x84] ss:$8 sps:$4 sm:$0xff]   ;;  %v693_v23 = vld [vmem:[#allocation2 + $0x80] ss:$8 sps:$4 sm:$0xff]  }
  0x2e   :  { %342 = vmatpush1.bf16.msra.mxu1 %v672_v9  ;;  %v694_v24 = vld [vmem:[#allocation2 + $0x94] ss:$8 sps:$4 sm:$0xff]   ;;  %v696_v25 = vld [vmem:[#allocation2 + $0x90] ss:$8 sps:$4 sm:$0xff]   ;;  %v697_v26 = vld [vmem:[#allocation2 + $0xa4] ss:$8 sps:$4 sm:$0xff]  }
  0x2f   :  { %343 = vmatprep.subr.bf16.mxu1 %v673_v10  ;;  %v699_v27 = vld [vmem:[#allocation2 + $0xa0] ss:$8 sps:$4 sm:$0xff]   ;;  %v700_v28 = vld [vmem:[#allocation2 + $0xb4] ss:$8 sps:$4 sm:$0xff]   ;;  %v702_v29 = vld [vmem:[#allocation2 + $0xb0] ss:$8 sps:$4 sm:$0xff]  }
  0x30   :  { %v703_v30 = vld [vmem:[#allocation2 + $0xc4] ss:$8 sps:$4 sm:$0xff]   ;;  %v705_v31 = vld [vmem:[#allocation2 + $0xc0] ss:$8 sps:$4 sm:$0xff]   ;;  %v706_v32 = vld [vmem:[#allocation2 + $0xd4] ss:$8 sps:$4 sm:$0xff]  }
  0x31   :  { %v708_v33 = vld [vmem:[#allocation2 + $0xd0] ss:$8 sps:$4 sm:$0xff]   ;;  %v709_v34 = vld [vmem:[#allocation2 + $0xe4] ss:$8 sps:$4 sm:$0xff]   ;;  %v711_v35 = vld [vmem:[#allocation2 + $0xe0] ss:$8 sps:$4 sm:$0xff]  }
  0x32   :  { %344 = vmatpush1.bf16.msra.mxu1 %v675_v11  ;;  %v712_v36 = vld [vmem:[#allocation2 + $0xf4] ss:$8 sps:$4 sm:$0xff]   ;;  %v714_v37 = vld [vmem:[#allocation2 + $0xf0] ss:$8 sps:$4 sm:$0xff]   ;;  %v715_v38 = vld [vmem:[#allocation4 + $0x40] sm:$0xff]   ;;  %v64_v51 = vsub.s32 0, %v63_v50 }
  0x33   :  { %345 = vmatprep.subr.bf16.mxu1 %v676_v12  ;;  %v716_v39 = vld [vmem:[#allocation4] sm:$0xff]   ;;  %v717_v40 = vld [vmem:[#allocation4 + $0x48] sm:$0xff]   ;;  %635 = vmatprep.subr.bf16.mxu0 %v715_v38  ;;  %v719_v42 = vld [vmem:[#allocation4 + $0x50] sm:$0xff]   ;;  %v68_v53 = vsub.s32 1, %v63_v50 }
  0x34   :  { %636 = vmatpush3.bf16.msra.mxu0 %v716_v39  ;;  %v718_v41 = vld [vmem:[#allocation4 + $0x8] sm:$0xff]   ;;  %v720_v43 = vld [vmem:[#allocation4 + $0x10] sm:$0xff]   ;;  %v721_v44 = vld [vmem:[#allocation4 + $0x58] sm:$0xff]  }
  0x35   :  { %637 = vmatprep.subr.bf16.mxu0 %v717_v40  ;;  %v722_v45 = vld [vmem:[#allocation4 + $0x18] sm:$0xff]   ;;  %v723_v46 = vld [vmem:[#allocation4 + $0x60] sm:$0xff]   ;;  %v725_v48 = vld [vmem:[#allocation4 + $0x68] sm:$0xff]  }
  0x36   :  { %346 = vmatpush1.bf16.msra.mxu1 %v678_v13  ;;  %v724_v47 = vld [vmem:[#allocation4 + $0x20] sm:$0xff]   ;;  %v726_v6 = vld [vmem:[#allocation4 + $0x28] sm:$0xff]   ;;  %v727_v7 = vld [vmem:[#allocation4 + $0x70] sm:$0xff]  }
  0x37   :  { %347 = vmatprep.subr.bf16.mxu1 %v679_v14  ;;  %v60_v52 = vld [vmem:[%s879_s2] sm:$0x3]  ;;  %v728_v8 = vld [vmem:[#allocation4 + $0x30] sm:$0xff]   ;;  %v729_v9 = vld [vmem:[#allocation4 + $0x78] sm:$0xff]  }
  0x38   :  { %638 = vmatpush3.bf16.msra.mxu0 %v718_v41  ;;  %v65_v54 = vrot.slane %v60_v52, %v64_v51  ;;  %v69_v55 = vrot.slane %v60_v52, %v68_v53  ;;  %v730_v10 = vld [vmem:[#allocation4 + $0x38] sm:$0xff]   ;;  %v167_v11 = vld [vmem:[%s881_s4] sm:$0x3] }
  0x39   :  { %639 = vmatprep.subr.bf16.mxu0 %v719_v42  ;;  %v172_v12 = vrot.slane %v167_v11, %v64_v51  ;;  %v176_v13 = vrot.slane %v167_v11, %v68_v53 }
  0x3a   :  { %348 = vmatpush1.bf16.msra.mxu1 %v681_v15 }
  0x3b   :  { %349 = vmatprep.subr.bf16.mxu1 %v682_v16 }
  0x3c   :  { %640 = vmatpush3.bf16.msra.mxu0 %v720_v43 }
  0x3d   :  { %641 = vmatprep.subr.bf16.mxu0 %v721_v44 }
  0x3e   :  { %350 = vmatpush1.bf16.msra.mxu1 %v684_v17 }
  0x3f   :  { %351 = vmatprep.subr.bf16.mxu1 %v685_v18 }
  0x40   :  { %642 = vmatpush3.bf16.msra.mxu0 %v722_v45 }
  0x41   :  { %643 = vmatprep.subr.bf16.mxu0 %v723_v46 }
  0x42   :  { %352 = vmatpush1.bf16.msra.mxu1 %v687_v19 }
  0x43   :  { %353 = vmatprep.subr.bf16.mxu1 %v688_v20 }
  0x44   :  { %644 = vmatpush3.bf16.msra.mxu0 %v724_v47 }
  0x45   :  { %645 = vmatprep.subr.bf16.mxu0 %v725_v48 }
  0x46   :  { %354 = vmatpush1.bf16.msra.mxu1 %v690_v21 }
  0x47   :  { %355 = vmatprep.subr.bf16.mxu1 %v691_v22 }
  0x48   :  { %646 = vmatpush3.bf16.msra.mxu0 %v726_v6 }
  0x49   :  { %647 = vmatprep.subr.bf16.mxu0 %v727_v7 }
  0x4a   :  { %356 = vmatpush1.bf16.msra.mxu1 %v693_v23 }
  0x4b   :  { %357 = vmatprep.subr.bf16.mxu1 %v694_v24 }
  0x4c   :  { %648 = vmatpush3.bf16.msra.mxu0 %v728_v8 }
  0x4d   :  { %649 = vmatprep.subr.bf16.mxu0 %v729_v9 }
  0x4e   :  { %358 = vmatpush1.bf16.msra.mxu1 %v696_v25 }
  0x4f   :  { %359 = vmatprep.subr.bf16.mxu1 %v697_v26 }
  0x50   :  { %650 = vmatpush3.bf16.msra.mxu0 %v730_v10 }
  0x52   :  { %360 = vmatpush1.bf16.msra.mxu1 %v699_v27 }
  0x53   :  { %361 = vmatprep.subr.bf16.mxu1 %v700_v28  ;;  %v565_v28 = vand.u32 127, %v62_v49 }
  0x55   :  { %vm566_vm1 = vcmp.ge.s32.totalorder %v565_v28, 4  ;;  %vm567_vm2 = vcmp.lt.s32.totalorder %v565_v28, 8 }
  0x56   :  { %362 = vmatpush1.bf16.msra.mxu1 %v702_v29  ;;  %vm568_vm3 = vmand %vm566_vm1, %vm567_vm2 }
  0x57   :  { %363 = vmatprep.subr.bf16.mxu1 %v703_v30  ;;  %v618_v30 = vld [vmem:[%s883_s6] ss:$0 sm:$0xff] }
  0x5a   :  { %364 = vmatpush1.bf16.msra.mxu1 %v705_v31 }
  0x5b   :  { %365 = vmatprep.subr.bf16.mxu1 %v706_v32 }
  0x5e   :  { %366 = vmatpush1.bf16.msra.mxu1 %v708_v33 }
  0x5f   :  { %367 = vmatprep.subr.bf16.mxu1 %v709_v34 }
  0x62   :  { %368 = vmatpush1.bf16.msra.mxu1 %v711_v35 }
  0x63   :  { %369 = vmatprep.subr.bf16.mxu1 %v712_v36 }
  0x66   :  { %370 = vmatpush1.bf16.msra.mxu1 %v714_v37 }
  0xfe   :  { %v120_v56 = vpop.f32.mrb[0].mxu0 }
  0xff   :  { %v121_v57 = vadd.f32 %v120_v56, %v65_v54  ;;  %v122_v58 = vpop.f32.mrb[1].mxu0 }
 0x100   :  { %v123_v59 = vadd.f32 %v122_v58, %v69_v55  ;;  %v124_v60 = vpop.f32.mrb[2].mxu0 }
 0x101   :  { %v125_v61 = vadd.f32 %v124_v60, %v65_v54  ;;  %v126_v62 = vpop.f32.mrb[3].mxu0  ;;  %v129_v0 = vmax.f32 %v121_v57, 0.0 }
 0x102   :  { %v127_v63 = vadd.f32 %v126_v62, %v69_v55  ;;  %v130_v2 = vmax.f32 %v123_v59, 0.0 }
 0x103   :  { %v131_v1 = vmax.f32 %v125_v61, 0.0 }
 0x104   :  { %v132_v3 = vmax.f32 %v127_v63, 0.0 }
 0x105   :  { %v133_v4 = vpack.c.bf16 %v131_v1, %v129_v0 }
 0x106   :  { %v134_v5 = vpack.c.bf16 %v132_v3, %v130_v2 }
 0x108   :  { %371 = vmatprep.mubr.bf16.mxu1 %v134_v5 }
 0x109   :  { %372 = vmatmul.mubr.bf16.vlgmr.msra.gmra.mrb[0].mxu1 %v133_v4 }
 0x1dc   :  { %v373_v14 = vpop.f32.mrb[0].mxu1 }
 0x1dd   :  { %v374_v15 = vadd.f32 %v373_v14, %v172_v12  ;;  %v375_v16 = vpop.f32.mrb[1].mxu1 }
 0x1de   :  { %v376_v17 = vadd.f32 %v375_v16, %v176_v13  ;;  %v377_v18 = vpop.f32.mrb[2].mxu1 }
 0x1df   :  { %v378_v19 = vadd.f32 %v377_v18, %v172_v12  ;;  %v379_v20 = vpop.f32.mrb[3].mxu1  ;;  %v382_v22 = vmax.f32 %v374_v15, 0.0 }
 0x1e0   :  { %v380_v21 = vadd.f32 %v379_v20, %v176_v13  ;;  %v383_v24 = vmax.f32 %v376_v17, 0.0 }
 0x1e1   :  { %v384_v23 = vmax.f32 %v378_v19, 0.0 }
 0x1e2   :  { %v385_v25 = vmax.f32 %v380_v21, 0.0 }
 0x1e3   :  { %v386_v26 = vpack.c.bf16 %v384_v23, %v382_v22 }
 0x1e4   :  { %v387_v27 = vpack.c.bf16 %v385_v25, %v383_v24 }
 0x1e6   :  { %555 = vmatprep.mubr.bf16.mxu0 %v387_v27 }
 0x1e7   :  { %556 = vmatmul.mubr.bf16.vlgmr.msra.gmra.mrb[4].mxu0 %v386_v26 }
 0x2ba   :  { %v651_v29 = vpop.f32.mrb[4].mxu0 }
 0x2bb   :  { %v652_v31 = vpop.f32.mrb[5].mxu0 }
 0x2bc   :  { %v653_v32 = vadd.f32 %v652_v31, %v651_v29  ;;  %v654_v33 = vpop.f32.mrb[6].mxu0 }
 0x2bd   :  { %v655_v34 = vpop.f32.mrb[7].mxu0 }
 0x2be   :  { %v558_v35 = vadd.f32 %v653_v32, %v618_v30  ;;  %v656_v36 = vadd.f32 %v655_v34, %v654_v33 }
 0x2c0   :  { %v569_v37 = vmax.f32 %v558_v35, -20.0  ;;  %v561_v38 = vadd.f32 %v656_v36, %v618_v30 }
 0x2c2   :  { %v571_v39 = vmin.f32 %v569_v37, 2.0  ;;  %v570_v40 = vmax.f32 %v561_v38, -20.0 }
 0x2c4   :  { %v573_v41 = vsel %vm568_vm3, %v571_v39, %v558_v35  ;;  %v572_v42 = vmin.f32 %v570_v40, 2.0 }
 0x2c5   :  { %575 = vst [vmem:[%s884_s7] sm:$0xff] %v573_v41 }
 0x2c6   :  { %v574_v43 = vsel %vm568_vm3, %v572_v42, %v561_v38 }
 0x2c7   :  { %576 = vst [vmem:[%s884_s7 + $0x8] sm:$0xff] %v574_v43 }
 0x2c8   :  { %581 = vsyncpa [#allocation3], 1 }
 0x2c9   :  { %582 = vsyncpa [#allocation5], 1 }

</bundles_post_ra>
